<compile_context>
chip_gen: v6e
topology: v6e:2x2x1
jax: 0.10.0
libtpu: 0.0.40
codegen_flags: <defaults>
</compile_context>

<pallas_src>
import jax
import jax.numpy as jnp
from jax.experimental import pallas as pl
from jax.experimental.pallas import tpu as pltpu


def _round_up(n, m):
    return ((n + m - 1) // m) * m


def mlp_kernel(x_ref, w1_ref, b_ref, w2_ref, o_ref):
    H = w1_ref.shape[1]          # hidden width
    O = w2_ref.shape[1]          # number of classes (compact, un-padded)

    # hidden = sigmoid(x @ W1 + b1); bf16 MXU operands, f32 accumulation.
    x_bf = x_ref[...].astype(jnp.bfloat16)          # in-kernel cast (VPU, free)
    h = jnp.dot(x_bf, w1_ref[...], preferred_element_type=jnp.float32)
    h = jax.nn.sigmoid(h + b_ref[0:1, :H])          # f32 elementwise

    # logits = hidden @ W2 + b2
    logits = jnp.dot(h.astype(jnp.bfloat16), w2_ref[...],
                     preferred_element_type=jnp.float32)
    logits = logits + b_ref[1:2, :O]

    # log_softmax over the class axis (max-shifted, f32).
    m = jnp.max(logits, axis=1, keepdims=True)
    shifted = logits - m
    lse = jnp.log(jnp.sum(jnp.exp(shifted), axis=1, keepdims=True))
    o_ref[...] = (shifted - lse).astype(o_ref.dtype)


def net_forward(x, w1, b1, w2, b2, *, tile_b=2048):
    """x: (B, F) f32; w1: (F, H); b1: (H,); w2: (H, O); b2: (O,)."""
    B, F = x.shape
    H = w1.shape[1]
    O = w2.shape[1]
    P = max(H, O)                                   # packed-bias row width

    # bf16 weights (halves weight HBM/VMEM traffic; MXU-native).  x stays f32.
    w1_bf = w1.astype(jnp.bfloat16)
    w2_bf = w2.astype(jnp.bfloat16)

    # Pack both biases (f32) into one operand: row 0 = b1, row 1 = b2.
    b_packed = jnp.zeros((2, P), jnp.float32)
    b_packed = b_packed.at[0, :H].set(b1.astype(jnp.float32).reshape(-1))
    b_packed = b_packed.at[1, :O].set(b2.astype(jnp.float32).reshape(-1))

    # Batch-row tile: multiple of 8 (sublane), large enough to amortize the
    # per-grid-step overhead, and chosen so the grid has >= 2 parallel steps
    # when the batch allows it (engages both TensorCores on v7x).
    tb = max(8, min(tile_b, _round_up(pl.cdiv(B, 2), 8)))
    grid = (pl.cdiv(B, tb),)                        # uneven last tile is clipped

    # Explicit VMEM budget: double-buffered x / output tiles, resident
    # (double-buffered) weights + biases, and compiler temporaries.
    vmem_est = (
        2 * tb * F * 4                 # x tile (f32), double-buffered
        + 2 * tb * O * 4               # output tile (f32), double-buffered
        + 2 * (F * H * 2 + H * O * 2)  # W1 / W2 (bf16), double-buffered
        + 2 * (2 * P * 4)              # packed biases (f32)
        + tb * (2 * H + 4 * O) * 4     # temporaries: x_bf16, h, logits, exp, ...
    )
    vmem_limit = int(min(max(2 * vmem_est, 32 << 20), 64 << 20))  # v7x-safe cap

    cost = pl.CostEstimate(
        flops=2 * B * (F * H + H * O) + B * (2 * H + 4 * O),
        transcendentals=B * (H + O),
        bytes_accessed=B * F * 4 + B * O * 4 + F * H * 2 + H * O * 2 + 2 * P * 4,
    )

    out = pl.pallas_call(
        mlp_kernel,
        out_shape=jax.ShapeDtypeStruct((B, O), jnp.float32),
        grid=grid,
        in_specs=[
            pl.BlockSpec((tb, F), lambda i: (i, 0)),   # x: tiled over batch
            pl.BlockSpec((F, H), lambda i: (0, 0)),    # W1: resident
            pl.BlockSpec((2, P), lambda i: (0, 0)),    # packed biases: resident
            pl.BlockSpec((H, O), lambda i: (0, 0)),    # W2: resident
        ],
        out_specs=pl.BlockSpec((tb, O), lambda i: (i, 0)),
        compiler_params=pltpu.CompilerParams(
            dimension_semantics=("parallel",),
            vmem_limit_bytes=vmem_limit,
        ),
        cost_estimate=cost,
    )(x.astype(jnp.float32), w1_bf, b_packed, w2_bf)

    return out


if __name__ == "__main__":
    # Small shapes consistent with the module's forward.
    batch, n_feature, n_hidden, n_out = 8, 32, 64, 16

    key = jax.random.PRNGKey(0)
    kx, kw1, kb1, kw2, kb2 = jax.random.split(key, 5)

    x = jax.random.normal(kx, (batch, n_feature), dtype=jnp.float32)
    # "Linear" parameters stored as (in, out) so the kernel computes
    # x @ W + b (PyTorch stores (out, in); this is its transpose).
    w1 = jax.random.normal(kw1, (n_feature, n_hidden), dtype=jnp.float32) * 0.1
    b1 = jax.random.normal(kb1, (n_hidden,), dtype=jnp.float32) * 0.1
    w2 = jax.random.normal(kw2, (n_hidden, n_out), dtype=jnp.float32) * 0.1
    b2 = jax.random.normal(kb2, (n_out,), dtype=jnp.float32) * 0.1

    out = net_forward(x, w1, b1, w2, b2)
    jax.block_until_ready(out)

    # Reference in plain f32 JAX (same math as the PyTorch forward).  Loose
    # tolerance accounts for the bf16 matmul operands inside the kernel.
    h_ref = jax.nn.sigmoid(x @ w1 + b1[None, :])
    logits_ref = h_ref @ w2 + b2[None, :]
    ref = jax.nn.log_softmax(logits_ref, axis=1)

    assert out.shape == (batch, n_out)
    assert jnp.allclose(out, ref, atol=2e-2, rtol=2e-2), (
        float(jnp.max(jnp.abs(out - ref))))

    print("KERNEL_OK")
</pallas_src>

<mosaic_0001>
module attributes {stable_mosaic.version = 11 : i64} {
  func.func @mlp_kernel(%arg0: i32, %arg1: memref<8x32xf32, #tpu.memory_space<vmem>>, %arg2: memref<32x64xbf16, #tpu.memory_space<vmem>>, %arg3: memref<2x64xf32, #tpu.memory_space<vmem>>, %arg4: memref<64x16xbf16, #tpu.memory_space<vmem>>, %arg5: memref<8x16xf32, #tpu.memory_space<vmem>>) attributes {dimension_semantics = [#tpu.dimension_semantics<parallel>], iteration_bounds = array<i64: 1>, scalar_prefetch = 0 : i64, scratch_operands = 0 : i64, tpu.core_type = #tpu.core_type<tc>, window_params = [{transform_indices = @transform_0, window_bounds = array<i64: 8, 32>}, {pipeline_mode = #tpu.pipeline_mode<synchronous>, transform_indices = @transform_1, window_bounds = array<i64: 32, 64>}, {pipeline_mode = #tpu.pipeline_mode<synchronous>, transform_indices = @transform_2, window_bounds = array<i64: 2, 64>}, {pipeline_mode = #tpu.pipeline_mode<synchronous>, transform_indices = @transform_3, window_bounds = array<i64: 64, 16>}, {transform_indices = @transform_4, window_bounds = array<i64: 8, 16>}]} {
    %c0 = arith.constant 0 : index
    %c0_0 = arith.constant 0 : index
    %0 = vector.load %arg1[%c0, %c0_0] : memref<8x32xf32, #tpu.memory_space<vmem>>, vector<8x32xf32>
    %1 = arith.truncf %0 : vector<8x32xf32> to vector<8x32xbf16>
    %c0_1 = arith.constant 0 : index
    %c0_2 = arith.constant 0 : index
    %2 = vector.load %arg2[%c0_1, %c0_2] : memref<32x64xbf16, #tpu.memory_space<vmem>>, vector<32x64xbf16>
    %cst = arith.constant dense<0.000000e+00> : vector<8x64xf32>
    %3 = tpu.matmul %1, %2, %cst {dimension_numbers = #tpu.dot_dimension_numbers<[1], [0], [0], [1], [0, 0, 1, 1], [], []>} : vector<8x32xbf16>, vector<32x64xbf16>, vector<8x64xf32> -> vector<8x64xf32>
    %c0_3 = arith.constant 0 : index
    %c0_4 = arith.constant 0 : index
    %4 = vector.load %arg3[%c0_3, %c0_4] : memref<2x64xf32, #tpu.memory_space<vmem>>, vector<1x64xf32>
    %5 = vector.broadcast %4 : vector<1x64xf32> to vector<8x64xf32>
    %6 = arith.addf %3, %5 : vector<8x64xf32>
    %7 = arith.negf %6 : vector<8x64xf32>
    %8 = math.exp %7 : vector<8x64xf32>
    %cst_5 = arith.constant 1.000000e+00 : f32
    %9 = vector.broadcast %cst_5 : f32 to vector<8x64xf32>
    %10 = arith.addf %9, %8 : vector<8x64xf32>
    %11 = arith.divf %9, %10 : vector<8x64xf32>
    %12 = arith.truncf %11 : vector<8x64xf32> to vector<8x64xbf16>
    %c0_6 = arith.constant 0 : index
    %c0_7 = arith.constant 0 : index
    %13 = vector.load %arg4[%c0_6, %c0_7] : memref<64x16xbf16, #tpu.memory_space<vmem>>, vector<64x16xbf16>
    %cst_8 = arith.constant dense<0.000000e+00> : vector<8x16xf32>
    %14 = tpu.matmul %12, %13, %cst_8 {dimension_numbers = #tpu.dot_dimension_numbers<[1], [0], [0], [1], [0, 0, 1, 1], [], []>} : vector<8x64xbf16>, vector<64x16xbf16>, vector<8x16xf32> -> vector<8x16xf32>
    %c1 = arith.constant 1 : index
    %c0_9 = arith.constant 0 : index
    %15 = vector.load %arg3[%c1, %c0_9] : memref<2x64xf32, #tpu.memory_space<vmem>>, vector<1x16xf32>
    %16 = vector.broadcast %15 : vector<1x16xf32> to vector<8x16xf32>
    %17 = arith.addf %14, %16 : vector<8x16xf32>
    %cst_10 = arith.constant dense<0xFF800000> : vector<8xf32>
    %18 = vector.multi_reduction <maximumf>, %17, %cst_10 [1] : vector<8x16xf32> to vector<8xf32>
    %19 = vector.shape_cast %18 : vector<8xf32> to vector<8x1xf32>
    %20 = vector.broadcast %19 : vector<8x1xf32> to vector<8x16xf32>
    %21 = arith.subf %17, %20 : vector<8x16xf32>
    %22 = math.exp %21 : vector<8x16xf32>
    %cst_11 = arith.constant dense<0.000000e+00> : vector<8xf32>
    %23 = vector.multi_reduction <add>, %22, %cst_11 [1] : vector<8x16xf32> to vector<8xf32>
    %24 = vector.shape_cast %23 : vector<8xf32> to vector<8x1xf32>
    %25 = math.log %24 : vector<8x1xf32>
    %26 = vector.broadcast %25 : vector<8x1xf32> to vector<8x16xf32>
    %27 = arith.subf %21, %26 : vector<8x16xf32>
    %c0_12 = arith.constant 0 : index
    %c0_13 = arith.constant 0 : index
    %28 = vector.load %arg5[%c0_12, %c0_13] : memref<8x16xf32, #tpu.memory_space<vmem>>, vector<8x16xf32>
    tpu.vector_store %arg5[%c0_12, %c0_13], %27 {strides = array<i32>} : memref<8x16xf32, #tpu.memory_space<vmem>>, vector<8x16xf32>,
    return
  }
  func.func @transform_0(%arg0: i32) -> (i32, i32) {
    %c0_i32 = arith.constant 0 : i32
    %c0_i32_0 = arith.constant 0 : i32
    return %arg0, %c0_i32 : i32, i32
  }
  func.func @transform_1(%arg0: i32) -> (i32, i32) {
    %c0_i32 = arith.constant 0 : i32
    %c0_i32_0 = arith.constant 0 : i32
    %c0_i32_1 = arith.constant 0 : i32
    return %c0_i32, %c0_i32_0 : i32, i32
  }
  func.func @transform_2(%arg0: i32) -> (i32, i32) {
    %c0_i32 = arith.constant 0 : i32
    %c0_i32_0 = arith.constant 0 : i32
    %c0_i32_1 = arith.constant 0 : i32
    return %c0_i32, %c0_i32_0 : i32, i32
  }
  func.func @transform_3(%arg0: i32) -> (i32, i32) {
    %c0_i32 = arith.constant 0 : i32
    %c0_i32_0 = arith.constant 0 : i32
    %c0_i32_1 = arith.constant 0 : i32
    return %c0_i32, %c0_i32_0 : i32, i32
  }
  func.func @transform_4(%arg0: i32) -> (i32, i32) {
    %c0_i32 = arith.constant 0 : i32
    %c0_i32_0 = arith.constant 0 : i32
    return %arg0, %c0_i32 : i32, i32
  }
}

</mosaic_0001>

<bundles_post_ra>
// kernel: tpu_custom_call.1
= control target key start
LH: loop header
LB: loop body
LE: loop exit
PB: predicated region body
PF: predicated region fallthrough
CT: control target
= control target key end

     0   :  { %v280_v1 = vmov 0.0   ;;  %vm281_vm0 = vmmov 0   ;;  %s341_s0 = inlined_call_operand.vmem [shape: f32[8,32], index: 0, kind: input, shape index: {}]   ;;  %s342_s1 = inlined_call_operand.vmem [shape: bf16[32,64], index: 1, kind: input, shape index: {}]   ;;  %s343_s2 = inlined_call_operand.vmem [shape: f32[2,64], index: 2, kind: input, shape index: {}]   ;;  %s344_s3 = inlined_call_operand.vmem [shape: bf16[64,16], index: 3, kind: input, shape index: {}]   ;;  %s345_s4 = inlined_call_operand.hbm [shape: f32[8,16], index: 4, kind: output, shape index: {}]  }
   0x1   :  { %v244_v0 = vld [vmem:[%s342_s1 + $0x8] sm:$0xff]   ;;  %221 = vmatprep.subr.bf16.mxu0 %v280_v1  ;;  %229 = vmatprep.subr.bf16.mxu1 %v280_v1  ;;  %v245_v2 = vld [vmem:[%s342_s1] sm:$0xff]  }
   0x2   :  { %222 = vmatpush3.bf16.msra.mxu0 %v244_v0  ;;  %225 = vmatprep.mubr.msk.bf16.mxu0 %vm281_vm0, %v280_v1  ;;  %v19_v3 = vld [vmem:[%s341_s0] sm:$0xff] }
   0x3   :  { %223 = vmatprep.subr.bf16.mxu0 %v280_v1  ;;  %237 = vmatprep.mubr.msk.bf16.mxu1 %vm281_vm0, %v280_v1  ;;  %v20_v4 = vpack.c.bf16 %v19_v3, %v19_v3 }
   0x4   :  { %9 = vsyncpa [#allocation3], 0  ;;  %vm42_vm1 = vcmask 261120   ;;  %v246_v5 = vld [vmem:[%s344_s3 + $0x18] sm:$0xff]   ;;  %v247_v6 = vld [vmem:[%s344_s3 + $0x10] sm:$0xff]   ;;  %vm130_vm2 = vcmask 523264  }
   0x5   :  { %230 = vmatpush3.bf16.msra.mxu1 %v246_v5  ;;  %v248_v7 = vld [vmem:[%s344_s3 + $0x8] sm:$0xff]   ;;  %v249_v8 = vld [vmem:[%s344_s3] sm:$0xff]   ;;  %vm174_vm3 = vcmask 130048  }
   0x6   :  { %224 = vmatpush3.bf16.msra.mxu0 %v245_v2  ;;  %231 = vmatprep.subr.bf16.mxu1 %v280_v1  ;;  %v202_v9 = vld [vmem:[%s343_s2] ss:$0 sm:$0xff]  ;;  %v207_v20 = vld [vmem:[%s343_s2 + $0x1] ss:$0 sm:$0xff]  ;;  %s282_s2 = smov [#allocation2]  }
   0x7   :  { %s194_s30 = sshll.u32 %s282_s2, 4  ;;  %s195_s30 = int_to_ptr.vmem [resolvable:$true] %s194_s30 }
   0x8   :  { %s258_s5 = scalar_lea.vmem %s195_s30, 128  ;;  %p263_p1 = scmp.lt.s32.totalorder %s195_s30, %s195_s30 }
   0x9   :  { %226 = vmatmul.mubr.msk.bf16.vlgmr.msra.gmra.mxu0 %vm42_vm1, %v20_v4  ;;  %232 = vmatpush3.bf16.msra.mxu1 %v247_v6  ;;  %p259_p0 = scmp.ne.s32.totalorder %s195_s30, %s258_s5  ;;  %p264_p2 = scmp.lt.s32.totalorder %s258_s5, %s258_s5 }
   0xa   :  { %233 = vmatprep.subr.bf16.mxu1 %v280_v1 }
   0xb   :  { %p265_p3 = por %p264_p2, %p263_p1 }
   0xd   :  { %234 = vmatpush3.bf16.msra.mxu1 %v248_v7  ;;  %p266_p4 = pnand %p265_p3, %p259_p0 }
   0xe   :  { %235 = vmatprep.subr.bf16.mxu1 %v280_v1 }
  0x11   :  { %236 = vmatpush3.bf16.msra.mxu1 %v249_v8 }
  0xc9   :  { %v80_v10 = vpop.f32.mrf.mxu0 }
  0xca   :  { %v81_v11 = vadd.f32 %v202_v9, %v80_v10 }
  0xcb   :  { %v227_v12 = vpop.f32.mrf.mxu0 }
  0xcc   :  { %v206_v13 = vmul.f32 -1.442695, %v81_v11 }
  0xcd   :  { %v83_v14 = vpop.f32.mrf.mxu0 }
  0xce   :  { %250 = vpow2.f32 %v206_v13 }
  0xcf   :  { %v228_v15 = vpop.f32.mrf.mxu0 }
  0xdb   :  { %v251_v16 = vpop.eup %250 }
  0xdc   :  { %v89_v17 = vadd.f32 1.0, %v251_v16 }
  0xde   :  { %252 = vrcp.f32 %v89_v17 }
  0xeb   :  { %v253_v18 = vpop.eup %252 }
  0xec   :  { %v92_v19 = vpack.c.bf16 %v253_v18, %v253_v18 }
  0xee   :  { %238 = vmatmul.mubr.msk.bf16.vlgmr.msra.gmra.mxu1 %vm130_vm2, %v92_v19 }
 0x1ae   :  { %v168_v21 = vpop.f32.mrf.mxu1 }
 0x1af   :  { %v169_v22 = vadd.f32 %v207_v20, %v168_v21 }
 0x1b0   :  { %v239_v23 = vpop.f32.mrf.mxu1 }
 0x1b1   :  { %v175_v24 = vsel %vm174_vm3, %v169_v22, -inf }
 0x1b2   :  { %176 = vmax.xlane.f32.xlu0 %v175_v24  ;;  %v171_v25 = vpop.f32.mrf.mxu1 }
 0x1b4   :  { %v240_v26 = vpop.f32.mrf.mxu1 }
 0x23b   :  { %v177_v27 = vpop.xlane.xlu0 %176 }
 0x23c   :  { %v178_v28 = vsub.f32 %v169_v22, %v177_v27 }
 0x23e   :  { %v179_v29 = vmul.f32 1.442695, %v178_v28 }
 0x240   :  { %254 = vpow2.f32 %v179_v29 }
 0x24d   :  { %v255_v30 = vpop.eup %254 }
 0x24e   :  { %v181_v31 = vsel %vm174_vm3, %v255_v30, 0.0 }
 0x24f   :  { %182 = vadd.xlane.f32.xlu0 %v181_v31 }
 0x2d8   :  { %v183_v32 = vpop.xlane.xlu0 %182 }
 0x2d9   :  { %256 = vlog2.f32 %v183_v32 }
 0x2e6   :  { %v257_v33 = vpop.eup %256 }
 0x2e7   :  { %v185_v34 = vmul.f32 0.6931472, %v257_v33 }
 0x2e9   :  { %v186_v35 = vsub.f32 %v178_v28, %v185_v34 }
 0x2eb   :  { %187 = vst.msk [vmem:[#allocation2] sm:$0xff] %vm174_vm3, %v186_v35 }
 0x2ec   :  { %269 = shalt.err (!%p266_p4)
}
 0x2ed   :  { %197 = dma.vmem_to_hbm [thread:$0]  %s195_s30, 128, %s345_s4, [#allocation3]  }
 0x2ee   :  { %278 = dma.done.wait [#allocation3], 128  }
 0x2ef   :  { %279 = vsyncadd [#allocation3], 4294967168 }
 0x2f0   :  { %201 = vsyncpa [#allocation3], 1 }

</bundles_post_ra>
